<compile_context>
chip_gen: v7x
topology: tpu7x:2x2x1
jax: 0.10.0
libtpu: 0.0.40
codegen_flags: <defaults>
</compile_context>

<pallas_src>
import functools

import jax
import jax.numpy as jnp
from jax.experimental import pallas as pl
from jax.experimental.pallas import tpu as pltpu

# OurActFunc hyper-parameters from the module's __init__.
DELTA_T = 0.08
SAT_I = 7.268
NS_T = 0.572

IN_FEATURES = 784
HID1 = 128
HID2 = 64
NUM_CLASSES = 10
PADDED_CLASSES = 128       # lane-dense fc3 *internal* width
NEG_INF = -1e30            # padded-logit bias (exp() underflows to 0)


# TODO(synk): the original OurActFunc class body is not included in the
# reference source; we implement the standard saturable-absorber ("optical")
# transmission model implied by (delta_T, sat_I, ns_T):
#   T(I) = 1 - ns_T - delta_T / (1 + I / sat_I),  I = |x|,  out = T(I) * x
def _our_act_kernel(x):
    """In-kernel activation: the divide is one EUP approx-reciprocal."""
    intensity = jnp.abs(x)
    # delta_T / (1 + I/sat_I) == delta_T*sat_I / (sat_I + I)
    transmission = (1.0 - NS_T) - (DELTA_T * SAT_I) * pl.reciprocal(
        SAT_I + intensity, approx=True)
    return x * transmission


def _our_act_ref(x):
    intensity = jnp.abs(x)
    transmission = 1.0 - NS_T - DELTA_T / (1.0 + intensity / SAT_I)
    return x * transmission


def _fcnet_kernel(x_ref, w1_ref, b1_ref, w2_ref, b2_ref, w3_ref, b3_ref, o_ref):
    # x arrives f32 from HBM (single read); cast to bf16 on the VPU in-kernel.
    x = x_ref[...].astype(jnp.bfloat16)                         # (TB, 784)

    # fc1: [TB, 784] @ [784, 128] (bf16 in, f32 acc) + bias; activation in f32.
    h = jnp.dot(x, w1_ref[...], preferred_element_type=jnp.float32) + b1_ref[...]
    h = _our_act_kernel(h)

    # fc2: [TB, 128] @ [128, 64]
    h = jnp.dot(h.astype(jnp.bfloat16), w2_ref[...],
                preferred_element_type=jnp.float32) + b2_ref[...]
    h = _our_act_kernel(h)

    # fc3 (lane-dense padded to 128 cols internally): [TB, 64] @ [64, 128]
    logits = jnp.dot(h.astype(jnp.bfloat16), w3_ref[...],
                     preferred_element_type=jnp.float32) + b3_ref[...]

    # log_softmax over the feature axis; padded columns carry -1e30 bias so
    # they never win the max and exp() underflows to exactly 0 in the sum.
    m = jnp.max(logits, axis=-1, keepdims=True)
    shifted = logits - m
    lse = jnp.log(jnp.sum(jnp.exp(shifted), axis=-1, keepdims=True))

    # Narrow store: only the 10 real class columns go back to HBM; the 118
    # padded columns never leave VMEM (masked vst is cheap — output is a tiny
    # fraction of HBM traffic here).
    o_ref[...] = (shifted - lse)[:, :NUM_CLASSES].astype(o_ref.dtype)


def _round_up(v, m):
    return -(-v // m) * m


def _choose_tb(batch, tb_max):
    """Batch tile.

    Small batch: one full block (block rows == array rows, always legal).
    Large batch: multiple of 256, <= tb_max, and <= ceil(B/2) rounded up to 256
    so the grid has >= 2 steps (megacore sharding on v7x + DMA/compute overlap).
    Ragged last block is handled by Pallas — no wrapper-side padding of x.
    """
    if batch <= 256:
        return batch
    half = _round_up(-(-batch // 2), 256)
    return max(256, min(tb_max, half))


@functools.partial(jax.jit, static_argnames=("tb_max",))
def fcnet_our1_forward(x, params, tb_max=2048):
    """x: [B, C, H, W] (NCHW like the PyTorch module).  Returns [B, 10] f32."""
    w1, b1, w2, b2, w3, b3 = params
    B = x.shape[0]
    x_flat = x.reshape(B, -1)  # torch.flatten(x, 1); stays f32 (cast in-kernel)
    assert x_flat.shape[1] == IN_FEATURES

    TB = _choose_tb(B, tb_max)
    nb = pl.cdiv(B, TB)

    # bf16 matmul weights (f32 accumulation happens on the MXU in-kernel).
    w1_bf = w1.astype(jnp.bfloat16)
    w2_bf = w2.astype(jnp.bfloat16)
    # Lane-dense fc3: zero-pad weight columns, push padded biases to -1e30.
    # (These are tiny arrays — negligible wrapper cost.)
    w3_pad = jnp.zeros((HID2, PADDED_CLASSES), jnp.float32)
    w3_pad = w3_pad.at[:, :NUM_CLASSES].set(w3).astype(jnp.bfloat16)
    b3_pad = jnp.full((1, PADDED_CLASSES), NEG_INF, jnp.float32)
    b3_pad = b3_pad.at[:, :NUM_CLASSES].set(b3)

    flops = 2 * B * (IN_FEATURES * HID1 + HID1 * HID2 + HID2 * PADDED_CLASSES)
    transcendentals = B * (HID1 + HID2 + PADDED_CLASSES + 1)
    bytes_accessed = (
        B * IN_FEATURES * 4                            # x (f32, single read)
        + B * NUM_CLASSES * 4                          # narrow f32 output
        + (w1_bf.size + w2_bf.size + w3_pad.size) * 2  # weights (bf16)
        + (b1.size + b2.size + b3_pad.size) * 4)       # biases (f32)

    out = pl.pallas_call(
        _fcnet_kernel,
        out_shape=jax.ShapeDtypeStruct((B, NUM_CLASSES), jnp.float32),
        grid_spec=pltpu.PrefetchScalarGridSpec(
            num_scalar_prefetch=0,
            grid=(nb,),
            in_specs=[
                pl.BlockSpec((TB, IN_FEATURES), lambda i: (i, 0)),        # x tile (f32)
                pl.BlockSpec((IN_FEATURES, HID1), lambda i: (0, 0)),      # w1
                pl.BlockSpec((1, HID1), lambda i: (0, 0)),                # b1
                pl.BlockSpec((HID1, HID2), lambda i: (0, 0)),             # w2
                pl.BlockSpec((1, HID2), lambda i: (0, 0)),                # b2
                pl.BlockSpec((HID2, PADDED_CLASSES), lambda i: (0, 0)),   # w3 (padded)
                pl.BlockSpec((1, PADDED_CLASSES), lambda i: (0, 0)),      # b3 (padded)
            ],
            out_specs=pl.BlockSpec((TB, NUM_CLASSES), lambda i: (i, 0)),  # narrow out
        ),
        compiler_params=pltpu.CompilerParams(
            dimension_semantics=("parallel",),   # megacore sharding on v7x
            vmem_limit_bytes=40 * 1024 * 1024,   # fits TB=2048 f32 x-tiles; < v7x 64 MiB
        ),
        cost_estimate=pl.CostEstimate(
            flops=flops,
            transcendentals=transcendentals,
            bytes_accessed=bytes_accessed,
        ),
    )(x_flat, w1_bf, b1, w2_bf, b2, w3_pad, b3_pad)

    return out   # already (B, 10): no post-kernel slice


def init_params(key):
    """Deterministic init mimicking nn.Linear default (U[-1/sqrt(fan_in), +])."""
    def linear(k, fan_in, fan_out):
        kw, kb = jax.random.split(k)
        bound = 1.0 / jnp.sqrt(float(fan_in))
        w = jax.random.uniform(kw, (fan_in, fan_out), jnp.float32, -bound, bound)
        b = jax.random.uniform(kb, (1, fan_out), jnp.float32, -bound, bound)
        return w, b

    k1, k2, k3 = jax.random.split(key, 3)
    w1, b1 = linear(k1, IN_FEATURES, HID1)
    w2, b2 = linear(k2, HID1, HID2)
    w3, b3 = linear(k3, HID2, NUM_CLASSES)
    return (w1, b1, w2, b2, w3, b3)


def _reference_forward_f32(x, params):
    """Pure-JAX f32 reference (module semantics)."""
    w1, b1, w2, b2, w3, b3 = params
    h = x.reshape(x.shape[0], -1).astype(jnp.float32)
    h = _our_act_ref(h @ w1 + b1)
    h = _our_act_ref(h @ w2 + b2)
    logits = h @ w3 + b3
    return jax.nn.log_softmax(logits, axis=1)


def _reference_forward_bf16(x, params):
    """Pure-JAX reference with the same bf16-in / f32-acc casts as the kernel.

    Note: the kernel additionally uses pl.reciprocal(approx=True) in the
    activation (~1e-3 relative), so tolerances are set accordingly.
    """
    w1, b1, w2, b2, w3, b3 = params
    h = x.reshape(x.shape[0], -1).astype(jnp.bfloat16)
    h = jnp.dot(h, w1.astype(jnp.bfloat16), preferred_element_type=jnp.float32) + b1
    h = _our_act_ref(h)
    h = jnp.dot(h.astype(jnp.bfloat16), w2.astype(jnp.bfloat16),
                preferred_element_type=jnp.float32) + b2
    h = _our_act_ref(h)
    logits = jnp.dot(h.astype(jnp.bfloat16), w3.astype(jnp.bfloat16),
                     preferred_element_type=jnp.float32) + b3
    return jax.nn.log_softmax(logits, axis=1)


if __name__ == "__main__":
    key = jax.random.PRNGKey(0)
    kp, kx = jax.random.split(key)

    params = init_params(kp)
    # MNIST-like input implied by 784 = 1*28*28 (small batch of 8).
    x = jax.random.normal(kx, (8, 1, 28, 28), dtype=jnp.float32)

    out = jax.block_until_ready(fcnet_our1_forward(x, params))
    assert out.shape == (8, 10)

    ref_matched = _reference_forward_bf16(x, params)   # same bf16 casts
    ref_f32 = _reference_forward_f32(x, params)        # module-exact f32
    assert jnp.allclose(out, ref_matched, atol=1e-2, rtol=1e-2), "mismatch vs bf16 reference"
    assert jnp.allclose(out, ref_f32, atol=5e-2, rtol=5e-2), "mismatch vs f32 reference"

    print("KERNEL_OK")
</pallas_src>

<mosaic_0001>
module attributes {stable_mosaic.version = 11 : i64} {
  func.func @_fcnet_kernel(%arg0: i32, %arg1: memref<8x784xf32, #tpu.memory_space<vmem>>, %arg2: memref<784x128xbf16, #tpu.memory_space<vmem>>, %arg3: memref<1x128xf32, #tpu.memory_space<vmem>>, %arg4: memref<128x64xbf16, #tpu.memory_space<vmem>>, %arg5: memref<1x64xf32, #tpu.memory_space<vmem>>, %arg6: memref<64x128xbf16, #tpu.memory_space<vmem>>, %arg7: memref<1x128xf32, #tpu.memory_space<vmem>>, %arg8: memref<8x10xf32, #tpu.memory_space<vmem>>) attributes {dimension_semantics = [#tpu.dimension_semantics<parallel>], iteration_bounds = array<i64: 1>, scalar_prefetch = 0 : i64, scratch_operands = 0 : i64, tpu.core_type = #tpu.core_type<tc>, window_params = [{transform_indices = @transform_0, window_bounds = array<i64: 8, 784>}, {pipeline_mode = #tpu.pipeline_mode<synchronous>, transform_indices = @transform_1, window_bounds = array<i64: 784, 128>}, {pipeline_mode = #tpu.pipeline_mode<synchronous>, transform_indices = @transform_2, window_bounds = array<i64: 1, 128>}, {pipeline_mode = #tpu.pipeline_mode<synchronous>, transform_indices = @transform_3, window_bounds = array<i64: 128, 64>}, {pipeline_mode = #tpu.pipeline_mode<synchronous>, transform_indices = @transform_4, window_bounds = array<i64: 1, 64>}, {pipeline_mode = #tpu.pipeline_mode<synchronous>, transform_indices = @transform_5, window_bounds = array<i64: 64, 128>}, {pipeline_mode = #tpu.pipeline_mode<synchronous>, transform_indices = @transform_6, window_bounds = array<i64: 1, 128>}, {transform_indices = @transform_7, window_bounds = array<i64: 8, 10>}]} {
    %c0 = arith.constant 0 : index
    %c0_0 = arith.constant 0 : index
    %0 = vector.load %arg1[%c0, %c0_0] : memref<8x784xf32, #tpu.memory_space<vmem>>, vector<8x784xf32>
    %1 = arith.truncf %0 : vector<8x784xf32> to vector<8x784xbf16>
    %c0_1 = arith.constant 0 : index
    %c0_2 = arith.constant 0 : index
    %2 = vector.load %arg2[%c0_1, %c0_2] : memref<784x128xbf16, #tpu.memory_space<vmem>>, vector<784x128xbf16>
    %cst = arith.constant dense<0.000000e+00> : vector<8x128xf32>
    %3 = tpu.matmul %1, %2, %cst {dimension_numbers = #tpu.dot_dimension_numbers<[1], [0], [0], [1], [0, 0, 1, 1], [], []>} : vector<8x784xbf16>, vector<784x128xbf16>, vector<8x128xf32> -> vector<8x128xf32>
    %c0_3 = arith.constant 0 : index
    %c0_4 = arith.constant 0 : index
    %4 = vector.load %arg3[%c0_3, %c0_4] : memref<1x128xf32, #tpu.memory_space<vmem>>, vector<1x128xf32>
    %5 = vector.broadcast %4 : vector<1x128xf32> to vector<8x128xf32>
    %6 = arith.addf %3, %5 : vector<8x128xf32>
    %7 = math.absf %6 : vector<8x128xf32>
    %cst_5 = arith.constant 7.268000e+00 : f32
    %8 = vector.broadcast %cst_5 : f32 to vector<8x128xf32>
    %9 = arith.addf %8, %7 : vector<8x128xf32>
    %10 = tpu.reciprocal %9 {approx = true} : vector<8x128xf32> -> vector<8x128xf32>
    %cst_6 = arith.constant 0.581439971 : f32
    %11 = vector.broadcast %cst_6 : f32 to vector<8x128xf32>
    %12 = arith.mulf %11, %10 : vector<8x128xf32>
    %cst_7 = arith.constant 4.280000e-01 : f32
    %13 = vector.broadcast %cst_7 : f32 to vector<8x128xf32>
    %14 = arith.subf %13, %12 : vector<8x128xf32>
    %15 = arith.mulf %6, %14 : vector<8x128xf32>
    %16 = arith.truncf %15 : vector<8x128xf32> to vector<8x128xbf16>
    %c0_8 = arith.constant 0 : index
    %c0_9 = arith.constant 0 : index
    %17 = vector.load %arg4[%c0_8, %c0_9] : memref<128x64xbf16, #tpu.memory_space<vmem>>, vector<128x64xbf16>
    %cst_10 = arith.constant dense<0.000000e+00> : vector<8x64xf32>
    %18 = tpu.matmul %16, %17, %cst_10 {dimension_numbers = #tpu.dot_dimension_numbers<[1], [0], [0], [1], [0, 0, 1, 1], [], []>} : vector<8x128xbf16>, vector<128x64xbf16>, vector<8x64xf32> -> vector<8x64xf32>
    %c0_11 = arith.constant 0 : index
    %c0_12 = arith.constant 0 : index
    %19 = vector.load %arg5[%c0_11, %c0_12] : memref<1x64xf32, #tpu.memory_space<vmem>>, vector<1x64xf32>
    %20 = vector.broadcast %19 : vector<1x64xf32> to vector<8x64xf32>
    %21 = arith.addf %18, %20 : vector<8x64xf32>
    %22 = math.absf %21 : vector<8x64xf32>
    %cst_13 = arith.constant 7.268000e+00 : f32
    %23 = vector.broadcast %cst_13 : f32 to vector<8x64xf32>
    %24 = arith.addf %23, %22 : vector<8x64xf32>
    %25 = tpu.reciprocal %24 {approx = true} : vector<8x64xf32> -> vector<8x64xf32>
    %cst_14 = arith.constant 0.581439971 : f32
    %26 = vector.broadcast %cst_14 : f32 to vector<8x64xf32>
    %27 = arith.mulf %26, %25 : vector<8x64xf32>
    %cst_15 = arith.constant 4.280000e-01 : f32
    %28 = vector.broadcast %cst_15 : f32 to vector<8x64xf32>
    %29 = arith.subf %28, %27 : vector<8x64xf32>
    %30 = arith.mulf %21, %29 : vector<8x64xf32>
    %31 = arith.truncf %30 : vector<8x64xf32> to vector<8x64xbf16>
    %c0_16 = arith.constant 0 : index
    %c0_17 = arith.constant 0 : index
    %32 = vector.load %arg6[%c0_16, %c0_17] : memref<64x128xbf16, #tpu.memory_space<vmem>>, vector<64x128xbf16>
    %cst_18 = arith.constant dense<0.000000e+00> : vector<8x128xf32>
    %33 = tpu.matmul %31, %32, %cst_18 {dimension_numbers = #tpu.dot_dimension_numbers<[1], [0], [0], [1], [0, 0, 1, 1], [], []>} : vector<8x64xbf16>, vector<64x128xbf16>, vector<8x128xf32> -> vector<8x128xf32>
    %c0_19 = arith.constant 0 : index
    %c0_20 = arith.constant 0 : index
    %34 = vector.load %arg7[%c0_19, %c0_20] : memref<1x128xf32, #tpu.memory_space<vmem>>, vector<1x128xf32>
    %35 = vector.broadcast %34 : vector<1x128xf32> to vector<8x128xf32>
    %36 = arith.addf %33, %35 : vector<8x128xf32>
    %cst_21 = arith.constant dense<0xFF800000> : vector<8xf32>
    %37 = vector.multi_reduction <maximumf>, %36, %cst_21 [1] : vector<8x128xf32> to vector<8xf32>
    %38 = vector.shape_cast %37 : vector<8xf32> to vector<8x1xf32>
    %39 = vector.broadcast %38 : vector<8x1xf32> to vector<8x128xf32>
    %40 = arith.subf %36, %39 : vector<8x128xf32>
    %41 = math.exp %40 : vector<8x128xf32>
    %cst_22 = arith.constant dense<0.000000e+00> : vector<8xf32>
    %42 = vector.multi_reduction <add>, %41, %cst_22 [1] : vector<8x128xf32> to vector<8xf32>
    %43 = vector.shape_cast %42 : vector<8xf32> to vector<8x1xf32>
    %44 = math.log %43 : vector<8x1xf32>
    %45 = vector.broadcast %44 : vector<8x1xf32> to vector<8x128xf32>
    %46 = arith.subf %40, %45 : vector<8x128xf32>
    %47 = vector.extract_strided_slice %46 {offsets = [0, 0], sizes = [8, 10], strides = [1, 1]} : vector<8x128xf32> to vector<8x10xf32>
    %c0_23 = arith.constant 0 : index
    %c0_24 = arith.constant 0 : index
    %48 = vector.load %arg8[%c0_23, %c0_24] : memref<8x10xf32, #tpu.memory_space<vmem>>, vector<8x10xf32>
    tpu.vector_store %arg8[%c0_23, %c0_24], %47 {strides = array<i32>} : memref<8x10xf32, #tpu.memory_space<vmem>>, vector<8x10xf32>,
    return
  }
  func.func @transform_0(%arg0: i32) -> (i32, i32) {
    %c0_i32 = arith.constant 0 : i32
    %c0_i32_0 = arith.constant 0 : i32
    return %arg0, %c0_i32 : i32, i32
  }
  func.func @transform_1(%arg0: i32) -> (i32, i32) {
    %c0_i32 = arith.constant 0 : i32
    %c0_i32_0 = arith.constant 0 : i32
    %c0_i32_1 = arith.constant 0 : i32
    return %c0_i32, %c0_i32_0 : i32, i32
  }
  func.func @transform_2(%arg0: i32) -> (i32, i32) {
    %c0_i32 = arith.constant 0 : i32
    %c0_i32_0 = arith.constant 0 : i32
    %c0_i32_1 = arith.constant 0 : i32
    return %c0_i32, %c0_i32_0 : i32, i32
  }
  func.func @transform_3(%arg0: i32) -> (i32, i32) {
    %c0_i32 = arith.constant 0 : i32
    %c0_i32_0 = arith.constant 0 : i32
    %c0_i32_1 = arith.constant 0 : i32
    return %c0_i32, %c0_i32_0 : i32, i32
  }
  func.func @transform_4(%arg0: i32) -> (i32, i32) {
    %c0_i32 = arith.constant 0 : i32
    %c0_i32_0 = arith.constant 0 : i32
    %c0_i32_1 = arith.constant 0 : i32
    return %c0_i32, %c0_i32_0 : i32, i32
  }
  func.func @transform_5(%arg0: i32) -> (i32, i32) {
    %c0_i32 = arith.constant 0 : i32
    %c0_i32_0 = arith.constant 0 : i32
    %c0_i32_1 = arith.constant 0 : i32
    return %c0_i32, %c0_i32_0 : i32, i32
  }
  func.func @transform_6(%arg0: i32) -> (i32, i32) {
    %c0_i32 = arith.constant 0 : i32
    %c0_i32_0 = arith.constant 0 : i32
    %c0_i32_1 = arith.constant 0 : i32
    return %c0_i32, %c0_i32_0 : i32, i32
  }
  func.func @transform_7(%arg0: i32) -> (i32, i32) {
    %c0_i32 = arith.constant 0 : i32
    %c0_i32_0 = arith.constant 0 : i32
    return %arg0, %c0_i32 : i32, i32
  }
}

</mosaic_0001>

<bundles_post_ra>
// kernel: fcnet_our1_forward.1
= control target key start
LH: loop header
LB: loop body
LE: loop exit
PB: predicated region body
PF: predicated region fallthrough
CT: control target
= control target key end

     0   :  { %v1121_v44 = vmov 0.0   ;;  %vm1122_vm0 = vmmov 0   ;;  %vm441_vm1 = vcmask 130048   ;;  %s1408_s0 = inlined_call_operand.vmem [shape: f32[8,784], index: 0, kind: input, shape index: {}]   ;;  %s1409_s1 = inlined_call_operand.vmem [shape: bf16[784,128], index: 1, kind: input, shape index: {}]   ;;  %s1410_s2 = inlined_call_operand.vmem [shape: f32[1,128], index: 2, kind: input, shape index: {}]   ;;  %s1411_s3 = inlined_call_operand.vmem [shape: bf16[128,64], index: 3, kind: input, shape index: {}]   ;;  %s1412_s4 = inlined_call_operand.vmem [shape: f32[1,64], index: 4, kind: input, shape index: {}]   ;;  %s1413_s5 = inlined_call_operand.vmem [shape: bf16[64,128], index: 5, kind: input, shape index: {}]   ;;  %s1414_s6 = inlined_call_operand.vmem [shape: f32[1,128], index: 6, kind: input, shape index: {}]   ;;  %s1415_s7 = inlined_call_operand.hbm [shape: f32[8,10], index: 7, kind: output, shape index: {}]  }
   0x1   :  { %v1028_v0 = vld [vmem:[%s1409_s1 + $0x40] sm:$0xff]   ;;  %v1032_v4 = vld [vmem:[%s1409_s1 + $0x48] sm:$0xff]   ;;  %v1036_v8 = vld [vmem:[%s1409_s1 + $0x50] sm:$0xff]  }
   0x2   :  { %v1029_v1 = vld [vmem:[%s1409_s1] sm:$0xff]   ;;  %905 = vmatprep.subr.bf16.mxu0 %v1028_v0  ;;  %v1033_v5 = vld [vmem:[%s1409_s1 + $0x8] sm:$0xff]   ;;  %v1037_v9 = vld [vmem:[%s1409_s1 + $0x10] sm:$0xff]  }
   0x3   :  { %v1030_v2 = vld [vmem:[%s1409_s1 + $0xc0] sm:$0xff]   ;;  %906 = vmatpush3.bf16.msra.mxu0 %v1029_v1  ;;  %v1034_v6 = vld [vmem:[%s1409_s1 + $0xc8] sm:$0xff]   ;;  %v1038_v10 = vld [vmem:[%s1409_s1 + $0xd0] sm:$0xff]  }
   0x4   :  { %v1031_v3 = vld [vmem:[%s1409_s1 + $0x80] sm:$0xff]   ;;  %927 = vmatprep.subr.bf16.mxu1 %v1030_v2  ;;  %907 = vmatprep.subr.bf16.mxu0 %v1032_v4  ;;  %v1035_v7 = vld [vmem:[%s1409_s1 + $0x88] sm:$0xff]   ;;  %v1039_v11 = vld [vmem:[%s1409_s1 + $0x90] sm:$0xff]  }
   0x5   :  { %928 = vmatpush3.bf16.msra.mxu1 %v1031_v3  ;;  %v1040_v12 = vld [vmem:[%s1409_s1 + $0x58] sm:$0xff]   ;;  %v1044_v16 = vld [vmem:[%s1409_s1 + $0x60] sm:$0xff]   ;;  %v1048_v20 = vld [vmem:[%s1409_s1 + $0x68] sm:$0xff]  }
   0x6   :  { %929 = vmatprep.subr.bf16.mxu1 %v1034_v6  ;;  %v1041_v13 = vld [vmem:[%s1409_s1 + $0x18] sm:$0xff]   ;;  %v1045_v17 = vld [vmem:[%s1409_s1 + $0x20] sm:$0xff]   ;;  %v1049_v21 = vld [vmem:[%s1409_s1 + $0x28] sm:$0xff]  }
   0x7   :  { %908 = vmatpush3.bf16.msra.mxu0 %v1033_v5  ;;  %v1042_v14 = vld [vmem:[%s1409_s1 + $0xd8] sm:$0xff]   ;;  %v1046_v18 = vld [vmem:[%s1409_s1 + $0xe0] sm:$0xff]   ;;  %v1050_v22 = vld [vmem:[%s1409_s1 + $0xe8] sm:$0xff]  }
   0x8   :  { %909 = vmatprep.subr.bf16.mxu0 %v1036_v8  ;;  %v1043_v15 = vld [vmem:[%s1409_s1 + $0x98] sm:$0xff]   ;;  %v1047_v19 = vld [vmem:[%s1409_s1 + $0xa0] sm:$0xff]   ;;  %v1051_v23 = vld [vmem:[%s1409_s1 + $0xa8] sm:$0xff]  }
   0x9   :  { %930 = vmatpush3.bf16.msra.mxu1 %v1035_v7  ;;  %v1052_v24 = vld [vmem:[%s1409_s1 + $0x70] sm:$0xff]   ;;  %v1056_v28 = vld [vmem:[%s1409_s1 + $0x78] sm:$0xff]   ;;  %v29_v31 = vld [vmem:[%s1408_s0 + $0x8] sm:$0xff] }
   0xa   :  { %931 = vmatprep.subr.bf16.mxu1 %v1038_v10  ;;  %v1053_v25 = vld [vmem:[%s1409_s1 + $0x30] sm:$0xff]   ;;  %v1057_v29 = vld [vmem:[%s1409_s1 + $0x38] sm:$0xff]   ;;  %v36_v32 = vpack.c.bf16 %v29_v31, %v29_v31  ;;  %v28_v34 = vld [vmem:[%s1408_s0] sm:$0xff] }
   0xb   :  { %910 = vmatpush3.bf16.msra.mxu0 %v1037_v9  ;;  %v1054_v26 = vld [vmem:[%s1409_s1 + $0xf0] sm:$0xff]   ;;  %v1058_v30 = vld [vmem:[%s1409_s1 + $0xf8] sm:$0xff]   ;;  %v35_v35 = vpack.c.bf16 %v28_v34, %v28_v34  ;;  %v1060_v36 = vld [vmem:[%s1409_s1 + $0x140] sm:$0xff]  }
   0xc   :  { %911 = vmatprep.subr.bf16.mxu0 %v1040_v12  ;;  %v1055_v27 = vld [vmem:[%s1409_s1 + $0xb0] sm:$0xff]   ;;  %v1059_v33 = vld [vmem:[%s1409_s1 + $0xb8] sm:$0xff]   ;;  %477 = vmatprep.mubr.bf16.mxu0 %v36_v32  ;;  %v1061_v39 = vld [vmem:[%s1409_s1 + $0x100] sm:$0xff]  }
   0xd   :  { %932 = vmatpush3.bf16.msra.mxu1 %v1039_v11  ;;  %v31_v37 = vld [vmem:[%s1408_s0 + $0x18] sm:$0xff]  ;;  %v30_v40 = vld [vmem:[%s1408_s0 + $0x10] sm:$0xff]  ;;  %v1062_v42 = vld [vmem:[%s1409_s1 + $0x148] sm:$0xff]  }
   0xe   :  { %933 = vmatprep.subr.bf16.mxu1 %v1042_v14  ;;  %v38_v38 = vpack.c.bf16 %v31_v37, %v31_v37  ;;  %v37_v41 = vpack.c.bf16 %v30_v40, %v30_v40  ;;  %v1063_v43 = vld [vmem:[%s1409_s1 + $0x108] sm:$0xff]   ;;  %v1064_v45 = vld [vmem:[%s1409_s1 + $0x150] sm:$0xff]   ;;  %v1066_v47 = vld [vmem:[%s1409_s1 + $0x158] sm:$0xff]  }
   0xf   :  { %912 = vmatpush3.bf16.msra.mxu0 %v1041_v13  ;;  %v1065_v46 = vld [vmem:[%s1409_s1 + $0x110] sm:$0xff]   ;;  %v1067_v48 = vld [vmem:[%s1409_s1 + $0x118] sm:$0xff]   ;;  %v1068_v49 = vld [vmem:[%s1409_s1 + $0x160] sm:$0xff]  }
  0x10   :  { %913 = vmatprep.subr.bf16.mxu0 %v1044_v16  ;;  %517 = vmatprep.mubr.bf16.mxu1 %v38_v38  ;;  %v1069_v50 = vld [vmem:[%s1409_s1 + $0x120] sm:$0xff]   ;;  %v1070_v51 = vld [vmem:[%s1409_s1 + $0x168] sm:$0xff]   ;;  %v1072_v55 = vld [vmem:[%s1409_s1 + $0x170] sm:$0xff]  }
  0x11   :  { %934 = vmatpush3.bf16.msra.mxu1 %v1043_v15  ;;  %v1071_v52 = vld [vmem:[%s1409_s1 + $0x128] sm:$0xff]   ;;  %v1076_v53 = vld [vmem:[%s1409_s1 + $0x180] sm:$0xff]   ;;  %v34_v57 = vld [vmem:[%s1408_s0 + $0x30] sm:$0xff] }
  0x12   :  { %935 = vmatprep.subr.bf16.mxu1 %v1046_v18  ;;  %v33_v54 = vld [vmem:[%s1408_s0 + $0x28] sm:$0xff]  ;;  %v41_v58 = vpack.c.bf16 %v34_v57, %v34_v57  ;;  %v1073_v59 = vld [vmem:[%s1409_s1 + $0x130] sm:$0xff]   ;;  %v1074_v60 = vld [vmem:[%s1409_s1 + $0x178] sm:$0xff]  }
  0x13   :  { %914 = vmatpush3.bf16.msra.mxu0 %v1045_v17  ;;  %v40_v56 = vpack.c.bf16 %v33_v54, %v33_v54 }
  0x14   :  { %915 = vmatprep.subr.bf16.mxu0 %v1048_v20 }
  0x15   :  { %936 = vmatpush3.bf16.msra.mxu1 %v1047_v19 }
  0x16   :  { %937 = vmatprep.subr.bf16.mxu1 %v1050_v22 }
  0x17   :  { %916 = vmatpush3.bf16.msra.mxu0 %v1049_v21 }
  0x18   :  { %917 = vmatprep.subr.bf16.mxu0 %v1052_v24 }
  0x19   :  { %938 = vmatpush3.bf16.msra.mxu1 %v1051_v23 }
  0x1a   :  { %939 = vmatprep.subr.bf16.mxu1 %v1054_v26 }
  0x1b   :  { %918 = vmatpush3.bf16.msra.mxu0 %v1053_v25 }
  0x1c   :  { %919 = vmatprep.subr.bf16.mxu0 %v1056_v28 }
  0x1d   :  { %940 = vmatpush3.bf16.msra.mxu1 %v1055_v27 }
  0x1e   :  { %941 = vmatprep.subr.bf16.mxu1 %v1058_v30 }
  0x1f   :  { %920 = vmatpush3.bf16.msra.mxu0 %v1057_v29 }
  0x20   :  { %949 = vmatprep.subr.bf16.mxu0 %v1060_v36 }
  0x21   :  { %942 = vmatpush3.bf16.msra.mxu1 %v1059_v33 }
  0x22   :  { %478 = vmatmul.mubr.bf16.vlgmr.msra.gmra.mrb[0].mxu0 %v35_v35  ;;  %987 = vmatprep.subr.bf16.mxu1 %v1121_v44 }
  0x23   :  { %950 = vmatpush3.bf16.msra.mxu0 %v1061_v39  ;;  %557 = vmatprep.mubr.bf16.mxu0 %v40_v56 }
  0x24   :  { %518 = vmatmul.mubr.bf16.vlgmr.msra.gmra.mrb[0].mxu1 %v37_v41  ;;  %951 = vmatprep.subr.bf16.mxu0 %v1062_v42 }
  0x25   :  { %989 = vmatprep.mubr.msk.bf16.mxu1 %vm1122_vm0, %v1121_v44  ;;  %988 = vmatpush3.bf16.msra.mxu1 %v1076_v53 }
  0x26   :  { %993 = vmatprep.subr.bf16.mxu1 %v1121_v44 }
  0x27   :  { %952 = vmatpush3.bf16.msra.mxu0 %v1063_v43 }
  0x28   :  { %953 = vmatprep.subr.bf16.mxu0 %v1064_v45 }
  0x2b   :  { %954 = vmatpush3.bf16.msra.mxu0 %v1065_v46 }
  0x2c   :  { %955 = vmatprep.subr.bf16.mxu0 %v1066_v47  ;;  %990 = vmatmul.mubr.msk.bf16.vlgmr.msra.gmra.mrb[4].mxu1 %vm441_vm1, %v41_v58 }
  0x2d   :  { %1009 = vmatprep.mubr.msk.bf16.mxu1 %vm1122_vm0, %v1121_v44 }
  0x2f   :  { %956 = vmatpush3.bf16.msra.mxu0 %v1067_v48 }
  0x30   :  { %957 = vmatprep.subr.bf16.mxu0 %v1068_v49 }
  0x33   :  { %958 = vmatpush3.bf16.msra.mxu0 %v1069_v50 }
  0x34   :  { %959 = vmatprep.subr.bf16.mxu0 %v1070_v51 }
  0x37   :  { %960 = vmatpush3.bf16.msra.mxu0 %v1071_v52 }
  0x38   :  { %961 = vmatprep.subr.bf16.mxu0 %v1072_v55 }
  0x39   :  { %12 = vsyncpa [#allocation3], 0  ;;  %v1075_v61 = vld [vmem:[%s1409_s1 + $0x138] sm:$0xff]   ;;  %v32_v62 = vld [vmem:[%s1408_s0 + $0x20] sm:$0xff]  ;;  %vm769_vm2 = vcmask 523264   ;;  %vm823_vm3 = vcmask 80896  }
  0x3a   :  { %v39_v63 = vpack.c.bf16 %v32_v62, %v32_v62  ;;  %v1077_v0 = vld [vmem:[%s1411_s3] sm:$0xff]   ;;  %v1078_v1 = vld [vmem:[%s1411_s3 + $0x8] sm:$0xff]   ;;  %v1079_v2 = vld [vmem:[%s1411_s3 + $0x10] sm:$0xff]  }
  0x3b   :  { %962 = vmatpush3.bf16.msra.mxu0 %v1073_v59  ;;  %994 = vmatpush3.bf16.msra.mxu1 %v1077_v0  ;;  %v1080_v3 = vld [vmem:[%s1411_s3 + $0x18] sm:$0xff]   ;;  %v1081_v4 = vld [vmem:[%s1411_s3 + $0x20] sm:$0xff]   ;;  %v1082_v5 = vld [vmem:[%s1411_s3 + $0x28] sm:$0xff]  }
  0x3c   :  { %963 = vmatprep.subr.bf16.mxu0 %v1074_v60  ;;  %995 = vmatprep.subr.bf16.mxu1 %v1121_v44  ;;  %v1083_v6 = vld [vmem:[%s1411_s3 + $0x30] sm:$0xff]   ;;  %v1084_v7 = vld [vmem:[%s1411_s3 + $0x38] sm:$0xff]   ;;  %v839_v9 = vld [vmem:[%s1410_s2] ss:$0 sm:$0xff] }
  0x3d   :  { %v1085_v39 = vld [vmem:[%s1413_s5] sm:$0xff]   ;;  %v1086_v40 = vld [vmem:[%s1413_s5 + $0x8] sm:$0xff]   ;;  %v1087_v41 = vld [vmem:[%s1413_s5 + $0x10] sm:$0xff]  }
  0x3e   :  { %v1088_v42 = vld [vmem:[%s1413_s5 + $0x18] sm:$0xff]   ;;  %v890_v43 = vld [vmem:[%s1412_s4] ss:$0 sm:$0xff]  ;;  %s1123_s4 = smov [#allocation2]  }
  0x3f   :  { %964 = vmatpush3.bf16.msra.mxu0 %v1075_v61  ;;  %996 = vmatpush3.bf16.msra.mxu1 %v1078_v1  ;;  %v899_v56 = vld [vmem:[%s1414_s6] ss:$0 sm:$0xff]  ;;  %s831_s1 = sshll.u32 %s1123_s4, 4  ;;  %s832_s1 = int_to_ptr.vmem [resolvable:$true] %s831_s1 }
  0x40   :  { %1013 = vmatprep.subr.bf16.mxu0 %v1121_v44  ;;  %997 = vmatprep.subr.bf16.mxu1 %v1121_v44  ;;  %s1097_s6 = scalar_lea.vmem %s832_s1, 128  ;;  %p1102_p1 = scmp.lt.s32.totalorder %s832_s1, %s832_s1 }
  0x41   :  { %p1098_p0 = scmp.ne.s32.totalorder %s832_s1, %s1097_s6  ;;  %p1103_p2 = scmp.lt.s32.totalorder %s1097_s6, %s1097_s6 }
  0x42   :  { %558 = vmatmul.mubr.bf16.vlgmr.msra.gmra.mrb[4].mxu0 %v39_v63 }
  0x43   :  { %1021 = vmatprep.mubr.msk.bf16.mxu0 %vm1122_vm0, %v1121_v44  ;;  %998 = vmatpush3.bf16.msra.mxu1 %v1079_v2  ;;  %p1104_p3 = por %p1103_p2, %p1102_p1 }
  0x44   :  { %999 = vmatprep.subr.bf16.mxu1 %v1121_v44  ;;  %1014 = vmatpush3.bf16.msra.mxu0 %v1085_v39 }
  0x45   :  { %1015 = vmatprep.subr.bf16.mxu0 %v1121_v44  ;;  %p1105_p4 = pnand %p1104_p3, %p1098_p0 }
  0x47   :  { %1000 = vmatpush3.bf16.msra.mxu1 %v1080_v3 }
  0x48   :  { %1001 = vmatprep.subr.bf16.mxu1 %v1121_v44  ;;  %1016 = vmatpush3.bf16.msra.mxu0 %v1086_v40 }
  0x49   :  { %1017 = vmatprep.subr.bf16.mxu0 %v1121_v44 }
  0x4b   :  { %1002 = vmatpush3.bf16.msra.mxu1 %v1081_v4 }
  0x4c   :  { %1003 = vmatprep.subr.bf16.mxu1 %v1121_v44  ;;  %1018 = vmatpush3.bf16.msra.mxu0 %v1087_v41 }
  0x4d   :  { %1019 = vmatprep.subr.bf16.mxu0 %v1121_v44 }
  0x4f   :  { %1004 = vmatpush3.bf16.msra.mxu1 %v1082_v5 }
  0x50   :  { %1005 = vmatprep.subr.bf16.mxu1 %v1121_v44  ;;  %1020 = vmatpush3.bf16.msra.mxu0 %v1088_v42 }
  0x53   :  { %1006 = vmatpush3.bf16.msra.mxu1 %v1083_v6 }
  0x54   :  { %1007 = vmatprep.subr.bf16.mxu1 %v1121_v44 }
  0x57   :  { %1008 = vmatpush3.bf16.msra.mxu1 %v1084_v7 }
  0xf5   :  { %v921_v8 = vpop.f32.mrb[0].mxu0 }
  0xf6   :  { %v922_v10 = vpop.f32.mrb[1].mxu0 }
  0xf7   :  { %v923_v11 = vadd.f32 %v922_v10, %v921_v8  ;;  %v924_v12 = vpop.f32.mrb[2].mxu0  ;;  %v943_v13 = vpop.f32.mrb[0].mxu1 }
  0xf8   :  { %v925_v14 = vpop.f32.mrb[3].mxu0  ;;  %v944_v16 = vpop.f32.mrb[1].mxu1 }
  0xf9   :  { %v480_v15 = vadd.f32 %v923_v11, %v839_v9  ;;  %v945_v17 = vadd.f32 %v944_v16, %v943_v13  ;;  %v946_v18 = vpop.f32.mrb[2].mxu1 }
  0xfa   :  { %v947_v19 = vpop.f32.mrb[3].mxu1 }
  0xfb   :  { %v520_v20 = vadd.f32 %v945_v17, %v480_v15 }
  0xff   :  { %v599_v21 = vpop.f32.mrb[4].mxu1 }
 0x100   :  { %v991_v22 = vpop.f32.mrb[5].mxu1 }
 0x101   :  { %v602_v23 = vpop.f32.mrb[6].mxu1 }
 0x102   :  { %v992_v24 = vpop.f32.mrb[7].mxu1 }
 0x115   :  { %v965_v25 = vpop.f32.mrb[4].mxu0 }
 0x116   :  { %v966_v26 = vpop.f32.mrb[5].mxu0 }
 0x117   :  { %v967_v27 = vadd.f32 %v966_v26, %v965_v25  ;;  %v968_v28 = vpop.f32.mrb[6].mxu0 }
 0x118   :  { %v969_v29 = vpop.f32.mrb[7].mxu0 }
 0x119   :  { %v560_v30 = vadd.f32 %v967_v27, %v520_v20 }
 0x11b   :  { %v600_v31 = vadd.f32 %v599_v21, %v560_v30 }
 0x11d   :  { %v605_v32 = vand.u32 2147483647, %v600_v31 }
 0x11f   :  { %v606_v33 = vadd.f32 7.268, %v605_v32 }
 0x121   :  { %1089 = vrcp.f32 %v606_v33 }
 0x12b   :  { %v1090_v34 = vpop.eup %1089 }
 0x12c   :  { %v608_v35 = vmul.f32 0.58144, %v1090_v34 }
 0x12e   :  { %v609_v36 = vsub.f32 0.428, %v608_v35 }
 0x130   :  { %v610_v37 = vmul.f32 %v609_v36, %v600_v31 }
 0x132   :  { %v611_v38 = vpack.c.bf16 %v610_v37, %v610_v37 }
 0x134   :  { %1010 = vmatmul.mubr.bf16.vlgmr.msra.gmra.mrb[8].mxu1 %v611_v38 }
 0x207   :  { %v717_v45 = vpop.f32.mrb[8].mxu1 }
 0x208   :  { %v718_v46 = vadd.f32 %v890_v43, %v717_v45  ;;  %v1011_v47 = vpop.f32.mrb[9].mxu1 }
 0x209   :  { %v720_v48 = vpop.f32.mrb[10].mxu1 }
 0x20a   :  { %v723_v49 = vand.u32 2147483647, %v718_v46  ;;  %v1012_v50 = vpop.f32.mrb[11].mxu1 }
 0x20c   :  { %v724_v51 = vadd.f32 7.268, %v723_v49 }
 0x20e   :  { %1091 = vrcp.f32 %v724_v51 }
 0x218   :  { %v1092_v52 = vpop.eup %1091 }
 0x219   :  { %v726_v53 = vmul.f32 0.58144, %v1092_v52 }
 0x21b   :  { %v727_v44 = vsub.f32 0.428, %v726_v53 }
 0x21d   :  { %v728_v54 = vmul.f32 %v727_v44, %v718_v46 }
 0x21f   :  { %v729_v55 = vpack.c.bf16 %v728_v54, %v728_v54 }
 0x221   :  { %1022 = vmatmul.mubr.msk.bf16.vlgmr.msra.gmra.mrb[8].mxu0 %vm769_vm2, %v729_v55 }
 0x2f4   :  { %v807_v57 = vpop.f32.mrb[8].mxu0 }
 0x2f5   :  { %v808_v58 = vadd.f32 %v899_v56, %v807_v57  ;;  %v1023_v59 = vpop.f32.mrb[9].mxu0 }
 0x2f6   :  { %v810_v60 = vpop.f32.mrb[10].mxu0 }
 0x2f7   :  { %813 = vmax.xlane.f32.xlu0 %v808_v58  ;;  %v1024_v61 = vpop.f32.mrb[11].mxu0 }
 0x384   :  { %v814_v62 = vpop.xlane.xlu0 %813 }
 0x385   :  { %v815_v63 = vsub.f32 %v808_v58, %v814_v62 }
 0x387   :  { %v816_v0 = vmul.f32 1.442695, %v815_v63 }
 0x389   :  { %1093 = vpow2.f32 %v816_v0 }
 0x393   :  { %v1094_v1 = vpop.eup %1093 }
 0x394   :  { %818 = vadd.xlane.f32.xlu0 %v1094_v1 }
 0x421   :  { %v819_v2 = vpop.xlane.xlu0 %818 }
 0x422   :  { %1095 = vlog2.f32 %v819_v2 }
 0x42c   :  { %v1096_v3 = vpop.eup %1095 }
 0x42d   :  { %v821_v4 = vmul.f32 0.6931472, %v1096_v3 }
 0x42f   :  { %v822_v5 = vsub.f32 %v815_v63, %v821_v4 }
 0x431   :  { %824 = vst.msk [vmem:[#allocation2] sm:$0xff] %vm823_vm3, %v822_v5 }
 0x432   :  { %1108 = shalt.err (!%p1105_p4)
}
 0x433   :  { %s1109_s24 = scalar_lea.hbm %s1415_s7, 128 }
 0x434   :  { %p1110_p5 = scmp.ne.s32.totalorder %s1415_s7, %s1109_s24  ;;  %p1113_p6 = scmp.lt.u32.totalorder %s1109_s24, %s1415_s7 }
 0x436   :  { %p1115_p7 = pnand %p1113_p6, %p1110_p5 }
 0x438   :  { %1118 = shalt.err (!%p1115_p7)
}
 0x439   :  { %834 = dma.vmem_to_hbm [thread:$0]  %s832_s1, 128, %s1415_s7, [#allocation3]  }
 0x43a   :  { %1119 = dma.done.wait [#allocation3], 128  }
 0x43b   :  { %1120 = vsyncadd [#allocation3], 4294967168 }
 0x43c   :  { %838 = vsyncpa [#allocation3], 1 }

</bundles_post_ra>
